<compile_context>
chip_gen: v7x
topology: tpu7x:2x2x1
jax: 0.10.0
libtpu: 0.0.40
codegen_flags: <defaults>
</compile_context>

<pallas_src>
import math
import jax
import jax.numpy as jnp
from jax.experimental import pallas as pl
from jax.experimental.pallas import tpu as pltpu

# ---- sizes (small, consistent with the module's config) ----
B, S, H = 2, 8, 32          # batch, seq, hidden_size
NH = 4                      # num_attention_heads
HD = H // NH                # attention_head_size
I = 64                      # intermediate_size
EPS = 1e-12                 # layer_norm_eps


def _layernorm(x, gamma, beta):
    mu = jnp.mean(x, axis=-1, keepdims=True)
    var = jnp.mean((x - mu) ** 2, axis=-1, keepdims=True)
    return (x - mu) * jax.lax.rsqrt(var + EPS) * gamma + beta


def _gelu(x):
    # exact gelu (erf form), matching pytorch_transformers' BertIntermediate
    return x * 0.5 * (1.0 + jax.lax.erf(x * (1.0 / math.sqrt(2.0))))


def attlayer_kernel(x_ref, mask_ref,
                    wqkv_ref, bqkv_ref,
                    wo_ref, bo_ref, g1_ref, be1_ref,
                    wi_ref, bi_ref, w2_ref, bo2_ref, g2_ref, be2_ref,
                    out_ref):
    x = x_ref[...]            # (B*S, H)   all tokens of all batches
    mask = mask_ref[...]      # (B, 1, S)  additive BERT mask

    # ---- fused Q/K/V projection: one MXU push, M = B*S rows ----
    qkv = jnp.dot(x, wqkv_ref[...],
                  preferred_element_type=jnp.float32) + bqkv_ref[...]   # (B*S, 3H)

    def head_stack(base):
        # gather the NH per-head (B, S, HD) blocks into a single (NH*B, S, HD)
        # leading-batch tensor (batch index = h*B + b); lane slices + leading
        # concat only, no 4-D transpose.
        return jnp.concatenate(
            [qkv[:, base + h * HD: base + (h + 1) * HD].reshape(B, S, HD)
             for h in range(NH)],
            axis=0)

    scale = 1.0 / math.sqrt(HD)
    q = head_stack(0) * scale        # (NH*B, S, HD), pre-scaled
    k = head_stack(H)
    v = head_stack(2 * H)

    # batched attention over all (head, batch) pairs at once
    s = jnp.einsum('bqd,bkd->bqk', q, k,
                   preferred_element_type=jnp.float32)      # (NH*B, S, S)
    mask_nb = jnp.concatenate([mask] * NH, axis=0)          # (NH*B, 1, S)
    s = s + mask_nb                                         # broadcast over query rows
    s = s - jnp.max(s, axis=-1, keepdims=True)
    p = jnp.exp(s)
    # exact division (not approx reciprocal) to preserve 2e-5 accuracy
    p = p / jnp.sum(p, axis=-1, keepdims=True)
    ctx = jnp.einsum('bqk,bkd->bqd', p, v,
                     preferred_element_type=jnp.float32)    # (NH*B, S, HD)

    # back to token-major (B*S, H) with heads on the lane axis (head-major cols)
    ctx = jnp.concatenate(
        [ctx[h * B:(h + 1) * B].reshape(B * S, HD) for h in range(NH)],
        axis=-1)                                            # (B*S, H)

    # BertSelfOutput: dense + residual + layernorm
    attn = jnp.dot(ctx, wo_ref[...],
                   preferred_element_type=jnp.float32) + bo_ref[...]
    attn = _layernorm(attn + x, g1_ref[...], be1_ref[...])

    # BertIntermediate: dense + gelu
    inter = _gelu(jnp.dot(attn, wi_ref[...],
                          preferred_element_type=jnp.float32) + bi_ref[...])

    # BertOutput: dense + residual + layernorm
    out = jnp.dot(inter, w2_ref[...],
                  preferred_element_type=jnp.float32) + bo2_ref[...]
    out_ref[...] = _layernorm(out + attn, g2_ref[...], be2_ref[...])


def attlayer_pallas(hidden, mask, params):
    """hidden: (B,S,H) f32, mask: (B,1,S) additive f32, params: list of 16 arrays."""
    (wq, bq, wk, bk, wv, bv, wo, bo, g1, be1,
     wi, bi, w2, bo2, g2, be2) = params

    # fuse Q/K/V weights & biases wrapper-side (one-time cost for static weights)
    wqkv = jnp.concatenate([wq, wk, wv], axis=1)   # (H, 3H)
    bqkv = jnp.concatenate([bq, bk, bv], axis=1)   # (1, 3H)
    fused = [wqkv, bqkv, wo, bo, g1, be1, wi, bi, w2, bo2, g2, be2]

    x2d = hidden.reshape(B * S, H)                 # whole batch in one block

    vmem = pl.BlockSpec(memory_space=pltpu.MemorySpace.VMEM)  # whole array in VMEM

    out2d = pl.pallas_call(
        attlayer_kernel,
        out_shape=jax.ShapeDtypeStruct((B * S, H), jnp.float32),
        in_specs=[vmem] * (2 + len(fused)),
        out_specs=vmem,
    )(x2d, mask, *fused)
    return out2d.reshape(B, S, H)


# ---- pure-JAX reference for verification ----
def attlayer_ref(x, mask2d, wq, bq, wk, bk, wv, bv, wo, bo, g1, be1,
                 wi, bi, w2, bo2, g2, be2):
    q = x @ wq + bq
    k = x @ wk + bk
    v = x @ wv + bv
    heads = lambda t: t.reshape(B, S, NH, HD).transpose(0, 2, 1, 3)
    qh, kh, vh = heads(q), heads(k), heads(v)
    s = jnp.einsum('bhqd,bhkd->bhqk', qh, kh) / math.sqrt(HD)
    s = s + mask2d[:, None, None, :]
    p = jax.nn.softmax(s, axis=-1)
    ctx = jnp.einsum('bhqk,bhkd->bhqd', p, vh).transpose(0, 2, 1, 3).reshape(B, S, H)
    attn = _layernorm(ctx @ wo + bo + x, g1, be1)
    inter = _gelu(attn @ wi + bi)
    return _layernorm(inter @ w2 + bo2 + attn, g2, be2)


if __name__ == "__main__":
    key = jax.random.PRNGKey(0)
    ks = jax.random.split(key, 12)

    hidden = 0.5 * jax.random.normal(ks[0], (B, S, H), dtype=jnp.float32)

    # additive attention mask: mask out last 2 tokens of batch 1 (BERT convention)
    valid = jnp.ones((B, S), dtype=jnp.float32).at[1, -2:].set(0.0)
    mask2d = (1.0 - valid) * -10000.0                 # (B, S)
    mask = mask2d.reshape(B, 1, S)                    # kernel layout

    def w(k_, shape):
        return 0.02 * jax.random.normal(k_, shape, dtype=jnp.float32)

    params = [
        w(ks[1], (H, H)), w(ks[2], (1, H)),           # query
        w(ks[3], (H, H)), w(ks[4], (1, H)),           # key
        w(ks[5], (H, H)), w(ks[6], (1, H)),           # value
        w(ks[7], (H, H)), w(ks[8], (1, H)),           # attention.output.dense
        jnp.ones((1, H), jnp.float32), jnp.zeros((1, H), jnp.float32),  # LN1 gamma/beta
        w(ks[9], (H, I)), w(ks[10], (1, I)),          # intermediate.dense
        w(ks[11], (I, H)), jnp.zeros((1, H), jnp.float32),              # output.dense
        jnp.ones((1, H), jnp.float32), jnp.zeros((1, H), jnp.float32),  # LN2 gamma/beta
    ]

    out = attlayer_pallas(hidden, mask, params)
    out = jax.block_until_ready(out)

    ref = attlayer_ref(hidden, mask2d, *params)
    assert out.shape == (B, S, H)
    assert jnp.allclose(out, ref, atol=2e-5, rtol=1e-4), "mismatch vs reference"

    print("KERNEL_OK")
</pallas_src>

<mosaic_0001>
module attributes {stable_mosaic.version = 11 : i64} {
  func.func @attlayer_kernel(%arg0: memref<16x32xf32, #tpu.memory_space<vmem>>, %arg1: memref<2x1x8xf32, #tpu.memory_space<vmem>>, %arg2: memref<32x96xf32, #tpu.memory_space<vmem>>, %arg3: memref<1x96xf32, #tpu.memory_space<vmem>>, %arg4: memref<32x32xf32, #tpu.memory_space<vmem>>, %arg5: memref<1x32xf32, #tpu.memory_space<vmem>>, %arg6: memref<1x32xf32, #tpu.memory_space<vmem>>, %arg7: memref<1x32xf32, #tpu.memory_space<vmem>>, %arg8: memref<32x64xf32, #tpu.memory_space<vmem>>, %arg9: memref<1x64xf32, #tpu.memory_space<vmem>>, %arg10: memref<64x32xf32, #tpu.memory_space<vmem>>, %arg11: memref<1x32xf32, #tpu.memory_space<vmem>>, %arg12: memref<1x32xf32, #tpu.memory_space<vmem>>, %arg13: memref<1x32xf32, #tpu.memory_space<vmem>>, %arg14: memref<16x32xf32, #tpu.memory_space<vmem>>) attributes {dimension_semantics = [], scalar_prefetch = 0 : i64, scratch_operands = 0 : i64, tpu.core_type = #tpu.core_type<tc>} {
    %c0 = arith.constant 0 : index
    %c0_0 = arith.constant 0 : index
    %0 = vector.load %arg0[%c0, %c0_0] : memref<16x32xf32, #tpu.memory_space<vmem>>, vector<16x32xf32>
    %c0_1 = arith.constant 0 : index
    %c0_2 = arith.constant 0 : index
    %c0_3 = arith.constant 0 : index
    %1 = vector.load %arg1[%c0_1, %c0_2, %c0_3] : memref<2x1x8xf32, #tpu.memory_space<vmem>>, vector<2x1x8xf32>
    %c0_4 = arith.constant 0 : index
    %c0_5 = arith.constant 0 : index
    %2 = vector.load %arg2[%c0_4, %c0_5] : memref<32x96xf32, #tpu.memory_space<vmem>>, vector<32x96xf32>
    %cst = arith.constant dense<0.000000e+00> : vector<16x96xf32>
    %3 = tpu.matmul %0, %2, %cst {dimension_numbers = #tpu.dot_dimension_numbers<[1], [0], [0], [1], [0, 0, 1, 1], [], []>} : vector<16x32xf32>, vector<32x96xf32>, vector<16x96xf32> -> vector<16x96xf32>
    %c0_6 = arith.constant 0 : index
    %c0_7 = arith.constant 0 : index
    %4 = vector.load %arg3[%c0_6, %c0_7] : memref<1x96xf32, #tpu.memory_space<vmem>>, vector<1x96xf32>
    %5 = vector.broadcast %4 : vector<1x96xf32> to vector<16x96xf32>
    %6 = arith.addf %3, %5 : vector<16x96xf32>
    %7 = vector.extract_strided_slice %6 {offsets = [0, 0], sizes = [16, 8], strides = [1, 1]} : vector<16x96xf32> to vector<16x8xf32>
    %8 = vector.shape_cast %7 : vector<16x8xf32> to vector<2x8x8xf32>
    %9 = vector.extract_strided_slice %6 {offsets = [0, 8], sizes = [16, 8], strides = [1, 1]} : vector<16x96xf32> to vector<16x8xf32>
    %10 = vector.shape_cast %9 : vector<16x8xf32> to vector<2x8x8xf32>
    %11 = vector.extract_strided_slice %6 {offsets = [0, 16], sizes = [16, 8], strides = [1, 1]} : vector<16x96xf32> to vector<16x8xf32>
    %12 = vector.shape_cast %11 : vector<16x8xf32> to vector<2x8x8xf32>
    %13 = vector.extract_strided_slice %6 {offsets = [0, 24], sizes = [16, 8], strides = [1, 1]} : vector<16x96xf32> to vector<16x8xf32>
    %14 = vector.shape_cast %13 : vector<16x8xf32> to vector<2x8x8xf32>
    %15 = tpu.concatenate %8, %10, %12, %14 in 0 : vector<2x8x8xf32>, vector<2x8x8xf32>, vector<2x8x8xf32>, vector<2x8x8xf32> -> vector<8x8x8xf32>
    %cst_8 = arith.constant 0.353553385 : f32
    %16 = vector.broadcast %cst_8 : f32 to vector<8x8x8xf32>
    %17 = arith.mulf %15, %16 : vector<8x8x8xf32>
    %18 = vector.extract_strided_slice %6 {offsets = [0, 32], sizes = [16, 8], strides = [1, 1]} : vector<16x96xf32> to vector<16x8xf32>
    %19 = vector.shape_cast %18 : vector<16x8xf32> to vector<2x8x8xf32>
    %20 = vector.extract_strided_slice %6 {offsets = [0, 40], sizes = [16, 8], strides = [1, 1]} : vector<16x96xf32> to vector<16x8xf32>
    %21 = vector.shape_cast %20 : vector<16x8xf32> to vector<2x8x8xf32>
    %22 = vector.extract_strided_slice %6 {offsets = [0, 48], sizes = [16, 8], strides = [1, 1]} : vector<16x96xf32> to vector<16x8xf32>
    %23 = vector.shape_cast %22 : vector<16x8xf32> to vector<2x8x8xf32>
    %24 = vector.extract_strided_slice %6 {offsets = [0, 56], sizes = [16, 8], strides = [1, 1]} : vector<16x96xf32> to vector<16x8xf32>
    %25 = vector.shape_cast %24 : vector<16x8xf32> to vector<2x8x8xf32>
    %26 = tpu.concatenate %19, %21, %23, %25 in 0 : vector<2x8x8xf32>, vector<2x8x8xf32>, vector<2x8x8xf32>, vector<2x8x8xf32> -> vector<8x8x8xf32>
    %27 = vector.extract_strided_slice %6 {offsets = [0, 64], sizes = [16, 8], strides = [1, 1]} : vector<16x96xf32> to vector<16x8xf32>
    %28 = vector.shape_cast %27 : vector<16x8xf32> to vector<2x8x8xf32>
    %29 = vector.extract_strided_slice %6 {offsets = [0, 72], sizes = [16, 8], strides = [1, 1]} : vector<16x96xf32> to vector<16x8xf32>
    %30 = vector.shape_cast %29 : vector<16x8xf32> to vector<2x8x8xf32>
    %31 = vector.extract_strided_slice %6 {offsets = [0, 80], sizes = [16, 8], strides = [1, 1]} : vector<16x96xf32> to vector<16x8xf32>
    %32 = vector.shape_cast %31 : vector<16x8xf32> to vector<2x8x8xf32>
    %33 = vector.extract_strided_slice %6 {offsets = [0, 88], sizes = [16, 8], strides = [1, 1]} : vector<16x96xf32> to vector<16x8xf32>
    %34 = vector.shape_cast %33 : vector<16x8xf32> to vector<2x8x8xf32>
    %35 = tpu.concatenate %28, %30, %32, %34 in 0 : vector<2x8x8xf32>, vector<2x8x8xf32>, vector<2x8x8xf32>, vector<2x8x8xf32> -> vector<8x8x8xf32>
    "tpu.trace_start"() <{level = 10 : i32, message = "bqd,bkd->bqk"}> : () -> ()
    %cst_9 = arith.constant dense<0.000000e+00> : vector<8x8x8xf32>
    %36 = tpu.matmul %17, %26, %cst_9 {dimension_numbers = #tpu.dot_dimension_numbers<[2], [2], [1], [1], [0, 0, 0, 1, 1, 1], [0], [0]>} : vector<8x8x8xf32>, vector<8x8x8xf32>, vector<8x8x8xf32> -> vector<8x8x8xf32>
    "tpu.trace_stop"() : () -> ()
    %37 = tpu.concatenate %1, %1, %1, %1 in 0 : vector<2x1x8xf32>, vector<2x1x8xf32>, vector<2x1x8xf32>, vector<2x1x8xf32> -> vector<8x1x8xf32>
    %38 = vector.broadcast %37 : vector<8x1x8xf32> to vector<8x8x8xf32>
    %39 = arith.addf %36, %38 : vector<8x8x8xf32>
    %cst_10 = arith.constant dense<0xFF800000> : vector<8x8xf32>
    %40 = vector.multi_reduction <maximumf>, %39, %cst_10 [2] : vector<8x8x8xf32> to vector<8x8xf32>
    %41 = vector.shape_cast %40 : vector<8x8xf32> to vector<8x8x1xf32>
    %42 = vector.broadcast %41 : vector<8x8x1xf32> to vector<8x8x8xf32>
    %43 = arith.subf %39, %42 : vector<8x8x8xf32>
    %44 = math.exp %43 : vector<8x8x8xf32>
    %cst_11 = arith.constant dense<0.000000e+00> : vector<8x8xf32>
    %45 = vector.multi_reduction <add>, %44, %cst_11 [2] : vector<8x8x8xf32> to vector<8x8xf32>
    %46 = vector.shape_cast %45 : vector<8x8xf32> to vector<8x8x1xf32>
    %47 = vector.broadcast %46 : vector<8x8x1xf32> to vector<8x8x8xf32>
    %48 = arith.divf %44, %47 : vector<8x8x8xf32>
    "tpu.trace_start"() <{level = 10 : i32, message = "bqk,bkd->bqd"}> : () -> ()
    %cst_12 = arith.constant dense<0.000000e+00> : vector<8x8x8xf32>
    %49 = tpu.matmul %48, %35, %cst_12 {dimension_numbers = #tpu.dot_dimension_numbers<[2], [1], [1], [2], [0, 0, 0, 1, 1, 2], [0], [0]>} : vector<8x8x8xf32>, vector<8x8x8xf32>, vector<8x8x8xf32> -> vector<8x8x8xf32>
    "tpu.trace_stop"() : () -> ()
    %50 = vector.extract_strided_slice %49 {offsets = [0, 0, 0], sizes = [2, 8, 8], strides = [1, 1, 1]} : vector<8x8x8xf32> to vector<2x8x8xf32>
    %51 = vector.shape_cast %50 : vector<2x8x8xf32> to vector<16x8xf32>
    %52 = vector.extract_strided_slice %49 {offsets = [2, 0, 0], sizes = [2, 8, 8], strides = [1, 1, 1]} : vector<8x8x8xf32> to vector<2x8x8xf32>
    %53 = vector.shape_cast %52 : vector<2x8x8xf32> to vector<16x8xf32>
    %54 = vector.extract_strided_slice %49 {offsets = [4, 0, 0], sizes = [2, 8, 8], strides = [1, 1, 1]} : vector<8x8x8xf32> to vector<2x8x8xf32>
    %55 = vector.shape_cast %54 : vector<2x8x8xf32> to vector<16x8xf32>
    %56 = vector.extract_strided_slice %49 {offsets = [6, 0, 0], sizes = [2, 8, 8], strides = [1, 1, 1]} : vector<8x8x8xf32> to vector<2x8x8xf32>
    %57 = vector.shape_cast %56 : vector<2x8x8xf32> to vector<16x8xf32>
    %58 = tpu.concatenate %51, %53, %55, %57 in 1 : vector<16x8xf32>, vector<16x8xf32>, vector<16x8xf32>, vector<16x8xf32> -> vector<16x32xf32>
    %c0_13 = arith.constant 0 : index
    %c0_14 = arith.constant 0 : index
    %59 = vector.load %arg4[%c0_13, %c0_14] : memref<32x32xf32, #tpu.memory_space<vmem>>, vector<32x32xf32>
    %cst_15 = arith.constant dense<0.000000e+00> : vector<16x32xf32>
    %60 = tpu.matmul %58, %59, %cst_15 {dimension_numbers = #tpu.dot_dimension_numbers<[1], [0], [0], [1], [0, 0, 1, 1], [], []>} : vector<16x32xf32>, vector<32x32xf32>, vector<16x32xf32> -> vector<16x32xf32>
    %c0_16 = arith.constant 0 : index
    %c0_17 = arith.constant 0 : index
    %61 = vector.load %arg5[%c0_16, %c0_17] : memref<1x32xf32, #tpu.memory_space<vmem>>, vector<1x32xf32>
    %62 = vector.broadcast %61 : vector<1x32xf32> to vector<16x32xf32>
    %63 = arith.addf %60, %62 : vector<16x32xf32>
    %64 = arith.addf %63, %0 : vector<16x32xf32>
    %c0_18 = arith.constant 0 : index
    %c0_19 = arith.constant 0 : index
    %65 = vector.load %arg6[%c0_18, %c0_19] : memref<1x32xf32, #tpu.memory_space<vmem>>, vector<1x32xf32>
    %c0_20 = arith.constant 0 : index
    %c0_21 = arith.constant 0 : index
    %66 = vector.load %arg7[%c0_20, %c0_21] : memref<1x32xf32, #tpu.memory_space<vmem>>, vector<1x32xf32>
    %cst_22 = arith.constant dense<0.000000e+00> : vector<16xf32>
    %67 = vector.multi_reduction <add>, %64, %cst_22 [1] : vector<16x32xf32> to vector<16xf32>
    %68 = vector.shape_cast %67 : vector<16xf32> to vector<16x1xf32>
    %cst_23 = arith.constant 3.200000e+01 : f32
    %69 = vector.broadcast %cst_23 : f32 to vector<16x1xf32>
    %70 = arith.divf %68, %69 : vector<16x1xf32>
    %71 = vector.broadcast %70 : vector<16x1xf32> to vector<16x32xf32>
    %72 = arith.subf %64, %71 : vector<16x32xf32>
    %73 = arith.mulf %72, %72 : vector<16x32xf32>
    %cst_24 = arith.constant dense<0.000000e+00> : vector<16xf32>
    %74 = vector.multi_reduction <add>, %73, %cst_24 [1] : vector<16x32xf32> to vector<16xf32>
    %75 = vector.shape_cast %74 : vector<16xf32> to vector<16x1xf32>
    %cst_25 = arith.constant 3.200000e+01 : f32
    %76 = vector.broadcast %cst_25 : f32 to vector<16x1xf32>
    %77 = arith.divf %75, %76 : vector<16x1xf32>
    %78 = vector.broadcast %70 : vector<16x1xf32> to vector<16x32xf32>
    %79 = arith.subf %64, %78 : vector<16x32xf32>
    %cst_26 = arith.constant 9.99999996E-13 : f32
    %80 = vector.broadcast %cst_26 : f32 to vector<16x1xf32>
    %81 = arith.addf %77, %80 : vector<16x1xf32>
    %82 = math.rsqrt %81 : vector<16x1xf32>
    %83 = vector.broadcast %82 : vector<16x1xf32> to vector<16x32xf32>
    %84 = arith.mulf %79, %83 : vector<16x32xf32>
    %85 = vector.broadcast %65 : vector<1x32xf32> to vector<16x32xf32>
    %86 = arith.mulf %84, %85 : vector<16x32xf32>
    %87 = vector.broadcast %66 : vector<1x32xf32> to vector<16x32xf32>
    %88 = arith.addf %86, %87 : vector<16x32xf32>
    %c0_27 = arith.constant 0 : index
    %c0_28 = arith.constant 0 : index
    %89 = vector.load %arg8[%c0_27, %c0_28] : memref<32x64xf32, #tpu.memory_space<vmem>>, vector<32x64xf32>
    %cst_29 = arith.constant dense<0.000000e+00> : vector<16x64xf32>
    %90 = tpu.matmul %88, %89, %cst_29 {dimension_numbers = #tpu.dot_dimension_numbers<[1], [0], [0], [1], [0, 0, 1, 1], [], []>} : vector<16x32xf32>, vector<32x64xf32>, vector<16x64xf32> -> vector<16x64xf32>
    %c0_30 = arith.constant 0 : index
    %c0_31 = arith.constant 0 : index
    %91 = vector.load %arg9[%c0_30, %c0_31] : memref<1x64xf32, #tpu.memory_space<vmem>>, vector<1x64xf32>
    %92 = vector.broadcast %91 : vector<1x64xf32> to vector<16x64xf32>
    %93 = arith.addf %90, %92 : vector<16x64xf32>
    %cst_32 = arith.constant 5.000000e-01 : f32
    %94 = vector.broadcast %cst_32 : f32 to vector<16x64xf32>
    %95 = arith.mulf %93, %94 : vector<16x64xf32>
    %cst_33 = arith.constant 0.707106769 : f32
    %96 = vector.broadcast %cst_33 : f32 to vector<16x64xf32>
    %97 = arith.mulf %93, %96 : vector<16x64xf32>
    %98 = math.erf %97 : vector<16x64xf32>
    %cst_34 = arith.constant 1.000000e+00 : f32
    %99 = vector.broadcast %cst_34 : f32 to vector<16x64xf32>
    %100 = arith.addf %99, %98 : vector<16x64xf32>
    %101 = arith.mulf %95, %100 : vector<16x64xf32>
    %c0_35 = arith.constant 0 : index
    %c0_36 = arith.constant 0 : index
    %102 = vector.load %arg10[%c0_35, %c0_36] : memref<64x32xf32, #tpu.memory_space<vmem>>, vector<64x32xf32>
    %cst_37 = arith.constant dense<0.000000e+00> : vector<16x32xf32>
    %103 = tpu.matmul %101, %102, %cst_37 {dimension_numbers = #tpu.dot_dimension_numbers<[1], [0], [0], [1], [0, 0, 1, 1], [], []>} : vector<16x64xf32>, vector<64x32xf32>, vector<16x32xf32> -> vector<16x32xf32>
    %c0_38 = arith.constant 0 : index
    %c0_39 = arith.constant 0 : index
    %104 = vector.load %arg11[%c0_38, %c0_39] : memref<1x32xf32, #tpu.memory_space<vmem>>, vector<1x32xf32>
    %105 = vector.broadcast %104 : vector<1x32xf32> to vector<16x32xf32>
    %106 = arith.addf %103, %105 : vector<16x32xf32>
    %107 = arith.addf %106, %88 : vector<16x32xf32>
    %c0_40 = arith.constant 0 : index
    %c0_41 = arith.constant 0 : index
    %108 = vector.load %arg12[%c0_40, %c0_41] : memref<1x32xf32, #tpu.memory_space<vmem>>, vector<1x32xf32>
    %c0_42 = arith.constant 0 : index
    %c0_43 = arith.constant 0 : index
    %109 = vector.load %arg13[%c0_42, %c0_43] : memref<1x32xf32, #tpu.memory_space<vmem>>, vector<1x32xf32>
    %cst_44 = arith.constant dense<0.000000e+00> : vector<16xf32>
    %110 = vector.multi_reduction <add>, %107, %cst_44 [1] : vector<16x32xf32> to vector<16xf32>
    %111 = vector.shape_cast %110 : vector<16xf32> to vector<16x1xf32>
    %cst_45 = arith.constant 3.200000e+01 : f32
    %112 = vector.broadcast %cst_45 : f32 to vector<16x1xf32>
    %113 = arith.divf %111, %112 : vector<16x1xf32>
    %114 = vector.broadcast %113 : vector<16x1xf32> to vector<16x32xf32>
    %115 = arith.subf %107, %114 : vector<16x32xf32>
    %116 = arith.mulf %115, %115 : vector<16x32xf32>
    %cst_46 = arith.constant dense<0.000000e+00> : vector<16xf32>
    %117 = vector.multi_reduction <add>, %116, %cst_46 [1] : vector<16x32xf32> to vector<16xf32>
    %118 = vector.shape_cast %117 : vector<16xf32> to vector<16x1xf32>
    %cst_47 = arith.constant 3.200000e+01 : f32
    %119 = vector.broadcast %cst_47 : f32 to vector<16x1xf32>
    %120 = arith.divf %118, %119 : vector<16x1xf32>
    %121 = vector.broadcast %113 : vector<16x1xf32> to vector<16x32xf32>
    %122 = arith.subf %107, %121 : vector<16x32xf32>
    %cst_48 = arith.constant 9.99999996E-13 : f32
    %123 = vector.broadcast %cst_48 : f32 to vector<16x1xf32>
    %124 = arith.addf %120, %123 : vector<16x1xf32>
    %125 = math.rsqrt %124 : vector<16x1xf32>
    %126 = vector.broadcast %125 : vector<16x1xf32> to vector<16x32xf32>
    %127 = arith.mulf %122, %126 : vector<16x32xf32>
    %128 = vector.broadcast %108 : vector<1x32xf32> to vector<16x32xf32>
    %129 = arith.mulf %127, %128 : vector<16x32xf32>
    %130 = vector.broadcast %109 : vector<1x32xf32> to vector<16x32xf32>
    %131 = arith.addf %129, %130 : vector<16x32xf32>
    %c0_49 = arith.constant 0 : index
    %c0_50 = arith.constant 0 : index
    %132 = vector.load %arg14[%c0_49, %c0_50] : memref<16x32xf32, #tpu.memory_space<vmem>>, vector<16x32xf32>
    tpu.vector_store %arg14[%c0_49, %c0_50], %131 {strides = array<i32>} : memref<16x32xf32, #tpu.memory_space<vmem>>, vector<16x32xf32>,
    return
  }
}

</mosaic_0001>

<bundles_post_ra>
// kernel: tpu_custom_call.1
= control target key start
LH: loop header
LB: loop body
LE: loop exit
PB: predicated region body
PF: predicated region fallthrough
CT: control target
= control target key end

     0   :  { %19 = vsyncpa [#allocation3], 0  ;;  %s2815_s0 = inlined_call_operand.hbm [shape: f32[16,32], index: 0, kind: input, shape index: {}]   ;;  %s2816_s1 = inlined_call_operand.vmem [shape: f32[2,1,8], index: 1, kind: input, shape index: {}]   ;;  %s2817_s2 = inlined_call_operand.vmem [shape: f32[32,96], index: 2, kind: input, shape index: {}]   ;;  %s2818_s3 = inlined_call_operand.vmem [shape: f32[1,96], index: 3, kind: input, shape index: {}]   ;;  %s2819_s4 = inlined_call_operand.vmem [shape: f32[32,32], index: 4, kind: input, shape index: {}]   ;;  %s2820_s5 = inlined_call_operand.vmem [shape: f32[1,32], index: 5, kind: input, shape index: {}]   ;;  %s2821_s6 = inlined_call_operand.vmem [shape: f32[1,32], index: 6, kind: input, shape index: {}]   ;;  %s2822_s7 = inlined_call_operand.hbm [shape: f32[1,32], index: 7, kind: input, shape index: {}]   ;;  %s2823_s8 = inlined_call_operand.vmem [shape: f32[32,64], index: 8, kind: input, shape index: {}]   ;;  %s2824_s9 = inlined_call_operand.hbm [shape: f32[1,64], index: 9, kind: input, shape index: {}]   ;;  %s2825_s10 = inlined_call_operand.vmem [shape: f32[64,32], index: 10, kind: input, shape index: {}]   ;;  %s2826_s11 = inlined_call_operand.vmem [shape: f32[1,32], index: 11, kind: input, shape index: {}]   ;;  %s2827_s12 = inlined_call_operand.vmem [shape: f32[1,32], index: 12, kind: input, shape index: {}]   ;;  %s2828_s13 = inlined_call_operand.vmem [shape: f32[1,32], index: 13, kind: input, shape index: {}]   ;;  %s2829_s14 = inlined_call_operand.hbm [shape: f32[16,32], index: 14, kind: output, shape index: {}]  }
   0x1   :  { %20 = vsyncpa [#allocation6], 0 }
   0x2   :  { %21 = vsyncpa [#allocation4], 0  ;;  %s2398_s29 = smov [#allocation5]   ;;  %s2399_s15 = smov [#allocation2]  }
   0x3   :  { %s52_s30 = sshll.u32 %s2398_s29, 4  ;;  %s27_s16 = sshll.u32 %s2399_s15, 4  ;;  %s53_s30 = int_to_ptr.vmem [resolvable:$true] %s52_s30  ;;  %s2488_s16 = int_to_ptr.vmem [resolvable:$true] %s27_s16 }
   0x4   :  { %s2304_s19 = scalar_lea.hbm %s2822_s7, 16 }
   0x5   :  { %p2305_p0 = scmp.ne.s32.totalorder %s2822_s7, %s2304_s19  ;;  %p2308_p1 = scmp.lt.u32.totalorder %s2304_s19, %s2822_s7 }
   0x7   :  { %p2310_p2 = pnand %p2308_p1, %p2305_p0 }
   0x9   :  { %2313 = shalt.err (!%p2310_p2)
}
   0xa   :  { %s2314_s24 = scalar_lea.vmem %s53_s30, 16  ;;  %s2318_s25 = scalar_lea.vmem %s53_s30, 32 }
   0xb   :  { %p2315_p3 = scmp.ne.s32.totalorder %s53_s30, %s2314_s24  ;;  %p2319_p4 = scmp.lt.s32.totalorder %s53_s30, %s53_s30 }
   0xc   :  { %p2320_p5 = scmp.lt.s32.totalorder %s2318_s25, %s2314_s24 }
   0xe   :  { %p2321_p6 = por %p2320_p5, %p2319_p4 }
  0x10   :  { %p2322_p7 = pnand %p2321_p6, %p2315_p3 }
  0x12   :  { %2325 = shalt.err (!%p2322_p7)
}
  0x13   :  { %55 = dma.hbm_to_vmem [thread:$0]  %s2822_s7, 16, %s53_s30, [#allocation6]  }
  0x14   :  { %s2326_s15 = scalar_lea.hbm %s2815_s0, 256 }
  0x15   :  { %p2327_p8 = scmp.ne.s32.totalorder %s2815_s0, %s2326_s15  ;;  %p2330_p9 = scmp.lt.u32.totalorder %s2326_s15, %s2815_s0 }
  0x17   :  { %p2332_p10 = pnand %p2330_p9, %p2327_p8 }
  0x19   :  { %2335 = shalt.err (!%p2332_p10)
}
  0x1a   :  { %s2336_s21 = scalar_lea.vmem %s2488_s16, 256  ;;  %p2341_p12 = scmp.lt.s32.totalorder %s2488_s16, %s2488_s16 }
  0x1b   :  { %p2337_p11 = scmp.ne.s32.totalorder %s2488_s16, %s2336_s21  ;;  %p2342_p13 = scmp.lt.s32.totalorder %s2336_s21, %s2336_s21 }
  0x1d   :  { %p2343_p0 = por %p2342_p13, %p2341_p12 }
  0x1f   :  { %p2344_p1 = pnand %p2343_p0, %p2337_p11 }
  0x21   :  { %2347 = shalt.err (!%p2344_p1)
}
  0x22   :  { %s2400_s7 = smov 128   ;;  %s2401_s30 = smov 8  }
  0x23   :  { %33 = dma.hbm_to_vmem [thread:$0]  %s2815_s0, 256, %s2488_s16, [#allocation3], %s2400_s7, %s2400_s7, %s2401_s30  }
  0x24   :  { %s2402_s24 = smov [#allocation7]   ;;  %s2348_s28 = scalar_lea.hbm %s2824_s9, 16 }
  0x25   :  { %s64_s25 = sshll.u32 %s2402_s24, 4  ;;  %p2349_p2 = scmp.ne.s32.totalorder %s2824_s9, %s2348_s28  ;;  %s65_s25 = int_to_ptr.vmem [resolvable:$true] %s64_s25 }
  0x26   :  { %p2352_p3 = scmp.lt.u32.totalorder %s2348_s28, %s2824_s9 }
  0x28   :  { %p2354_p4 = pnand %p2352_p3, %p2349_p2 }
  0x2a   :  { %2357 = shalt.err (!%p2354_p4)
}
  0x2b   :  { %s2358_s19 = scalar_lea.vmem %s65_s25, 16  ;;  %s2362_s0 = scalar_lea.vmem %s65_s25, 32 }
  0x2c   :  { %p2359_p5 = scmp.ne.s32.totalorder %s65_s25, %s2358_s19  ;;  %p2363_p6 = scmp.lt.s32.totalorder %s65_s25, %s65_s25 }
  0x2d   :  { %p2364_p7 = scmp.lt.s32.totalorder %s2362_s0, %s2358_s19 }
  0x2f   :  { %p2365_p8 = por %p2364_p7, %p2363_p6 }
  0x31   :  { %p2366_p9 = pnand %p2365_p8, %p2359_p5 }
  0x33   :  { %2369 = shalt.err (!%p2366_p9)
}
  0x34   :  { %67 = dma.hbm_to_vmem [thread:$0]  %s2824_s9, 16, %s65_s25, [#allocation6]  }
  0x35   :  { %2392 = dma.done.wait [#allocation3], 256  }
  0x36   :  { %2393 = vsyncadd [#allocation3], 4294967040 }
  0x37   :  { %2394 = dma.done.wait [#allocation6], 32  }
  0x38   :  { %2395 = vsyncadd [#allocation6], 4294967264  ;;  %vm100_vm0 = vcmask 261120   ;;  %v89_v0 = vld [vmem:[%s2817_s2] sm:$0xff]  ;;  %v90_v1 = vld [vmem:[%s2817_s2 + $0x8] sm:$0xff]  ;;  %v2403_v10 = vmov 0.0  }
  0x39   :  { %v91_v2 = vld [vmem:[%s2817_s2 + $0x10] sm:$0xff]  ;;  %v2205_v3 = vpack.c.bf16 %v90_v1, %v89_v0  ;;  %v92_v4 = vld [vmem:[%s2817_s2 + $0x18] sm:$0xff]  ;;  %v2546_v5 = vld [vmem:[#allocation2] sm:$0xff]  ;;  %2094 = vmatprep.subr.mxu0 %v2403_v10  ;;  %s2404_s2 = smov 112   ;;  %s2405_s15 = smov 120   ;;  %vm2406_vm1 = vmmov 0  }
  0x3a   :  { %v2209_v6 = vpack.c.bf16 %v92_v4, %v91_v2  ;;  %2081 = vmatprep.mubr.msk.f32.mxu1 %vm100_vm0, %v2546_v5  ;;  %v2550_v7 = vld [vmem:[#allocation2 + $0x8] sm:$0xff]  ;;  %v1971_v8 = vld [vmem:[%s2818_s3] ss:$0 sm:$0xff]  ;;  %2096 = vmatprep.mubr.msk.f32.mxu0 %vm2406_vm1, %v2403_v10  ;;  %s2407_s3 = smov 104   ;;  %s2408_s17 = smov 96   ;;  %vm224_vm2 = vcmask 64512  }
  0x3b   :  { %2206 = vmatprep.subr.bf16.mxu1 %v2205_v3  ;;  %v1974_v36 = vld [vmem:[%s2816_s1] ss:$0 sm:$0xff]  ;;  %v1975_v40 = vld [vmem:[%s2816_s1 + $0x1] ss:$0 sm:$0xff]  ;;  %s2409_s1 = smov 64   ;;  %s2410_s9 = smov 16  }
  0x3c   :  { %2208 = vmatpush3.bf16.msra.mxu1 %v2205_v3  ;;  %s2411_s25 = smov 24   ;;  %vm1561_vm3 = vcmask 130048   ;;  %vm1564_vm4 = vcmask 195584   ;;  %vm1823_vm5 = vcmask 523264   ;;  %s2412_s19 = smov [#allocation8]  }
  0x3d   :  { %2210 = vmatprep.subr.bf16.mxu1 %v2209_v6  ;;  %s1958_s0 = sshll.u32 %s2412_s19, 4  ;;  %s1959_s0 = int_to_ptr.vmem [resolvable:$true] %s1958_s0 }
  0x3e   :  { %s2370_s16 = scalar_lea.vmem %s1959_s0, 256  ;;  %p2375_p11 = scmp.lt.s32.totalorder %s1959_s0, %s1959_s0 }
  0x3f   :  { %p2371_p10 = scmp.ne.s32.totalorder %s1959_s0, %s2370_s16  ;;  %p2376_p12 = scmp.lt.s32.totalorder %s2370_s16, %s2370_s16 }
  0x40   :  { %2212 = vmatpush3.bf16.msra.mxu1 %v2209_v6 }
  0x41   :  { %2084 = vmatprep.subr.mxu1 %v2403_v10  ;;  %p2377_p13 = por %p2376_p12, %p2375_p11 }
  0x43   :  { %2082 = vmatmul.mubr.msk.f32.vlgmr.msra.gmra.mrb[0].mxu1 %vm100_vm0, %v2550_v7  ;;  %p2378_p0 = pnand %p2377_p13, %p2371_p10 }
  0x44   :  { %2086 = vmatprep.mubr.msk.f32.mxu1 %vm2406_vm1, %v2403_v10 }
 0x116   :  { %v2083_v9 = vpop.f32.mrb[0].mxu1 }
 0x117   :  { %v173_v11 = vpop.f32.mrb[1].mxu1  ;;  %v2567_v13 = vadd.f32 %v2083_v9, %v1971_v8 }
 0x118   :  { %v2559_v12 = vadd.f32 %v1971_v8, %v173_v11 }
 0x119   :  { %v203_v23 = vmul.f32 0.35355338, %v2567_v13 }
 0x11a   :  { %190 = vrot.lane.b32.xlu1 %v2559_v12, %s2404_s2  ;;  %184 = vrot.lane.b32.xlu0 %v2559_v12, %s2405_s15  ;;  %v202_v21 = vmul.f32 0.35355338, %v2559_v12 }
 0x11e   :  { %192 = vrot.lane.b32.xlu1 %v2567_v13, %s2404_s2  ;;  %186 = vrot.lane.b32.xlu0 %v2567_v13, %s2405_s15 }
 0x122   :  { %198 = vrot.lane.b32.xlu1 %v2567_v13, %s2407_s3  ;;  %196 = vrot.lane.b32.xlu0 %v2559_v12, %s2407_s3 }
 0x126   :  { %300 = vrot.lane.b32.xlu1 %v2567_v13, %s2408_s17  ;;  %222 = vrot.lane.b32.xlu0 %v2559_v12, %s2408_s17 }
 0x18c   :  { %v2575_v14 = vpop.permute.xlu1 %190  ;;  %v2577_v15 = vpop.permute.xlu0 %184 }
 0x18d   :  { %377 = vrot.lane.b32.xlu0 %v2577_v15, %s2408_s17  ;;  %v204_v25 = vmul.f32 0.35355338, %v2577_v15  ;;  %v206_v28 = vmul.f32 0.35355338, %v2575_v14 }
 0x190   :  { %v2580_v16 = vpop.permute.xlu1 %192  ;;  %v2582_v17 = vpop.permute.xlu0 %186 }
 0x191   :  { %531 = vrot.lane.b32.xlu0 %v2575_v14, %s2408_s17  ;;  %454 = vrot.lane.b32.xlu1 %v2582_v17, %s2408_s17  ;;  %v205_v29 = vmul.f32 0.35355338, %v2582_v17  ;;  %v207_v32 = vmul.f32 0.35355338, %v2580_v16 }
 0x194   :  { %v2586_v18 = vpop.permute.xlu0 %196  ;;  %v2590_v19 = vpop.permute.xlu1 %198 }
 0x195   :  { %608 = vrot.lane.b32.xlu1 %v2580_v16, %s2408_s17  ;;  %685 = vrot.lane.b32.xlu0 %v2586_v18, %s2408_s17  ;;  %v208_v33 = vmul.f32 0.35355338, %v2586_v18  ;;  %v209_v35 = vmul.f32 0.35355338, %v2590_v19 }
 0x198   :  { %v223_v20 = vpop.permute.xlu0 %222  ;;  %v301_v22 = vpop.permute.xlu1 %300 }
 0x199   :  { %762 = vrot.lane.b32.xlu1 %v2590_v19, %s2408_s17  ;;  %2085 = vmatpush3.xpose.msk.msra.mxu1 %vm224_vm2, %v223_v20 }
 0x19a   :  { %2089 = vmatprep.subr.mxu1 %v2403_v10 }
 0x19c   :  { %2087 = vmatmul.mubr.msk.f32.vlgmr.msra.gmra.mrb[2].mxu1 %vm224_vm2, %v202_v21 }
 0x19d   :  { %2090 = vmatpush3.xpose.msk.msra.mxu1 %vm224_vm2, %v301_v22  ;;  %2091 = vmatprep.mubr.msk.f32.mxu1 %vm2406_vm1, %v2403_v10 }
 0x19e   :  { %2099 = vmatprep.subr.mxu1 %v2403_v10 }
 0x1a0   :  { %2092 = vmatmul.mubr.msk.f32.vlgmr.msra.gmra.mrb[4].mxu1 %vm224_vm2, %v203_v23 }
 0x1a1   :  { %2101 = vmatprep.mubr.msk.f32.mxu1 %vm2406_vm1, %v2403_v10 }
 0x1ff   :  { %v378_v24 = vpop.permute.xlu0 %377 }
 0x200   :  { %2095 = vmatpush3.xpose.msk.msra.mxu0 %vm224_vm2, %v378_v24 }
 0x201   :  { %2104 = vmatprep.subr.mxu0 %v2403_v10 }
 0x203   :  { %v455_v26 = vpop.permute.xlu1 %454  ;;  %2097 = vmatmul.mubr.msk.f32.vlgmr.msra.gmra.mrb[0].mxu0 %vm224_vm2, %v204_v25  ;;  %v532_v27 = vpop.permute.xlu0 %531 }
 0x204   :  { %2100 = vmatpush3.xpose.msk.msra.mxu1 %vm224_vm2, %v455_v26  ;;  %2105 = vmatpush3.xpose.msk.msra.mxu0 %vm224_vm2, %v532_v27 }
 0x205   :  { %2106 = vmatprep.mubr.msk.f32.mxu0 %vm2406_vm1, %v2403_v10  ;;  %2114 = vmatprep.subr.mxu0 %v2403_v10 }
 0x206   :  { %2109 = vmatprep.subr.mxu1 %v2403_v10 }
 0x207   :  { %v609_v30 = vpop.permute.xlu1 %608  ;;  %2107 = vmatmul.mubr.msk.f32.vlgmr.msra.gmra.mrb[2].mxu0 %vm224_vm2, %v206_v28  ;;  %v686_v31 = vpop.permute.xlu0 %685  ;;  %2102 = vmatmul.mubr.msk.f32.vlgmr.msra.gmra.mrb[6].mxu1 %vm224_vm2, %v205_v29 }
 0x208   :  { %2110 = vmatpush3.xpose.msk.msra.mxu1 %vm224_vm2, %v609_v30  ;;  %2115 = vmatpush3.xpose.msk.msra.mxu0 %vm224_vm2, %v686_v31 }
 0x209   :  { %2111 = vmatprep.mubr.msk.f32.mxu1 %vm2406_vm1, %v2403_v10  ;;  %2116 = vmatprep.mubr.msk.f32.mxu0 %vm2406_vm1, %v2403_v10 }
 0x20a   :  { %2119 = vmatprep.subr.mxu1 %v2403_v10  ;;  %2124 = vmatprep.subr.mxu0 %v2403_v10 }
 0x20b   :  { %v763_v34 = vpop.permute.xlu1 %762  ;;  %2112 = vmatmul.mubr.msk.f32.vlgmr.msra.gmra.mrb[8].mxu1 %vm224_vm2, %v207_v32  ;;  %2117 = vmatmul.mubr.msk.f32.vlgmr.msra.gmra.mrb[4].mxu0 %vm224_vm2, %v208_v33 }
 0x20c   :  { %2120 = vmatpush3.xpose.msk.msra.mxu1 %vm224_vm2, %v763_v34  ;;  %2121 = vmatprep.mubr.msk.f32.mxu1 %vm2406_vm1, %v2403_v10 }
 0x20d   :  { %2129 = vmatprep.subr.mxu1 %v2403_v10  ;;  %2126 = vmatprep.mubr.msk.f32.mxu0 %vm2406_vm1, %v2403_v10 }
 0x20f   :  { %2122 = vmatmul.mubr.msk.f32.vlgmr.msra.gmra.mrb[10].mxu1 %vm224_vm2, %v209_v35 }
 0x210   :  { %2131 = vmatprep.mubr.msk.f32.mxu1 %vm2406_vm1, %v2403_v10 }
 0x26f   :  { %v296_v37 = vpop.f32.mrb[2].mxu1 }
 0x270   :  { %v297_v38 = vadd.f32 %v1974_v36, %v296_v37  ;;  %v2088_v39 = vpop.f32.mrb[3].mxu1 }
 0x272   :  { %v839_v41 = vsel %vm224_vm2, %v297_v38, -inf }
 0x273   :  { %840 = vmax.xlane.f32.xlu0 %v839_v41  ;;  %v373_v42 = vpop.f32.mrb[4].mxu1 }
 0x274   :  { %v374_v43 = vadd.f32 %v1975_v40, %v373_v42  ;;  %v2093_v44 = vpop.f32.mrb[5].mxu1 }
 0x276   :  { %v842_v45 = vsel %vm224_vm2, %v374_v43, -inf }
 0x277   :  { %843 = vmax.xlane.f32.xlu1 %v842_v45 }
 0x2d6   :  { %v450_v46 = vpop.f32.mrb[0].mxu0 }
 0x2d7   :  { %v451_v47 = vadd.f32 %v1974_v36, %v450_v46  ;;  %v2098_v48 = vpop.f32.mrb[1].mxu0 }
 0x2d9   :  { %v845_v49 = vsel %vm224_vm2, %v451_v47, -inf }
 0x2da   :  { %v604_v50 = vpop.f32.mrb[2].mxu0  ;;  %846 = vmax.xlane.f32.xlu0 %v845_v49  ;;  %v527_v51 = vpop.f32.mrb[6].mxu1 }
 0x2db   :  { %v605_v52 = vadd.f32 %v1974_v36, %v604_v50  ;;  %v528_v53 = vadd.f32 %v1975_v40, %v527_v51  ;;  %v2103_v54 = vpop.f32.mrb[7].mxu1  ;;  %v2108_v55 = vpop.f32.mrb[3].mxu0 }
 0x2dd   :  { %v851_v56 = vsel %vm224_vm2, %v605_v52, -inf  ;;  %v848_v57 = vsel %vm224_vm2, %v528_v53, -inf }
 0x2de   :  { %v758_v58 = vpop.f32.mrb[4].mxu0  ;;  %852 = vmax.xlane.f32.xlu1 %v851_v56  ;;  %849 = vmax.xlane.f32.xlu0 %v848_v57  ;;  %v681_v59 = vpop.f32.mrb[8].mxu1 }
 0x2df   :  { %v759_v60 = vadd.f32 %v1974_v36, %v758_v58  ;;  %v682_v61 = vadd.f32 %v1975_v40, %v681_v59  ;;  %v2113_v62 = vpop.f32.mrb[9].mxu1  ;;  %v2118_v63 = vpop.f32.mrb[5].mxu0 }
 0x2e1   :  { %v857_v0 = vsel %vm224_vm2, %v759_v60, -inf  ;;  %v854_v1 = vsel %vm224_vm2, %v682_v61, -inf }
 0x2e2   :  { %858 = vmax.xlane.f32.xlu1 %v857_v0  ;;  %855 = vmax.xlane.f32.xlu0 %v854_v1  ;;  %v835_v2 = vpop.f32.mrb[10].mxu1 }
 0x2e3   :  { %v836_v3 = vadd.f32 %v1975_v40, %v835_v2  ;;  %v2123_v4 = vpop.f32.mrb[11].mxu1 }
 0x2e5   :  { %v860_v6 = vsel %vm224_vm2, %v836_v3, -inf }
 0x2e6   :  { %861 = vmax.xlane.f32.xlu0 %v860_v6 }
 0x2f3   :  { %927 = vrot.lane.b32.xlu1 %v2559_v12, %s2409_s1 }
 0x2f7   :  { %1079 = vrot.lane.b32.xlu1 %v2577_v15, %s2409_s1 }
 0x2fb   :  { %1155 = vrot.lane.b32.xlu1 %v2582_v17, %s2409_s1 }
 0x2fc   :  { %1003 = vrot.lane.b32.xlu0 %v2567_v13, %s2409_s1 }
 0x2ff   :  { %1307 = vrot.lane.b32.xlu1 %v2580_v16, %s2409_s1 }
 0x300   :  { %1231 = vrot.lane.b32.xlu0 %v2575_v14, %s2409_s1  ;;  %v841_v11 = vpop.xlane.xlu0 %840 }
 0x301   :  { %v863_v20 = vsub.f32 %v297_v38, %v841_v11 }
 0x303   :  { %v871_v21 = vmul.f32 1.442695, %v863_v20 }
 0x304   :  { %v844_v8 = vpop.xlane.xlu1 %843 }
 0x305   :  { %v864_v9 = vsub.f32 %v374_v43, %v844_v8 }
 0x307   :  { %v873_v12 = vmul.f32 1.442695, %v864_v9 }
 0x309   :  { %2260 = vpow2.f32 %v873_v12 }
 0x30a   :  { %2262 = vpow2.f32 %v871_v21 }
 0x313   :  { %v2667_v15 = vpop.eup %2260 }
 0x314   :  { %v890_v17 = vsel %vm224_vm2, %v2667_v15, 0.0  ;;  %v2671_v13 = vpop.eup %2262 }
 0x315   :  { %v887_v16 = vsel %vm224_vm2, %v2671_v13, 0.0 }
 0x31f   :  { %891 = vadd.xlane.f32.xlu0 %v890_v17 }
 0x323   :  { %888 = vadd.xlane.f32.xlu1 %v887_v16 }
 0x367   :  { %v847_v14 = vpop.xlane.xlu0 %846 }
 0x368   :  { %v865_v22 = vsub.f32 %v451_v47, %v847_v14 }
 0x36a   :  { %v875_v23 = vmul.f32 1.442695, %v865_v22 }
 0x36b   :  { %v853_v24 = vpop.xlane.xlu1 %852  ;;  %v850_v25 = vpop.xlane.xlu0 %849 }
 0x36c   :  { %2264 = vpow2.f32 %v875_v23  ;;  %v867_v26 = vsub.f32 %v605_v52, %v853_v24  ;;  %v866_v27 = vsub.f32 %v528_v53, %v850_v25 }
 0x36e   :  { %v879_v28 = vmul.f32 1.442695, %v867_v26  ;;  %v877_v29 = vmul.f32 1.442695, %v866_v27  ;;  %v1567_v26 = vld [vmem:[%s2819_s4] sm:$0xff]  ;;  %v1568_v27 = vld [vmem:[%s2819_s4 + $0x8] sm:$0xff] }
 0x36f   :  { %v859_v30 = vpop.xlane.xlu1 %858  ;;  %v856_v31 = vpop.xlane.xlu0 %855 }
 0x370   :  { %2266 = vpow2.f32 %v879_v28  ;;  %v869_v32 = vsub.f32 %v759_v60, %v859_v30  ;;  %v868_v33 = vsub.f32 %v682_v61, %v856_v31  ;;  %v2213_v28 = vpack.c.bf16 %v1568_v27, %v1567_v26  ;;  %v2004_v26 = vld [vmem:[#allocation5] ss:$0 sm:$0xff] }
 0x371   :  { %2268 = vpow2.f32 %v877_v29  ;;  %v1570_v29 = vld [vmem:[%s2819_s4 + $0x18] sm:$0xff] }
 0x372   :  { %v883_v34 = vmul.f32 1.442695, %v869_v32  ;;  %v881_v35 = vmul.f32 1.442695, %v868_v33 }
 0x373   :  { %v928_v36 = vpop.permute.xlu1 %927  ;;  %v862_v37 = vpop.xlane.xlu0 %861 }
 0x374   :  { %2270 = vpow2.f32 %v883_v34  ;;  %v870_v38 = vsub.f32 %v836_v3, %v862_v37  ;;  %2125 = vmatpush3.msra.mxu0 %v928_v36 }
 0x375   :  { %2272 = vpow2.f32 %v881_v35  ;;  %2134 = vmatprep.subr.mxu0 %v2403_v10 }
 0x376   :  { %v2265_v39 = vpop.eup %2264  ;;  %v885_v40 = vmul.f32 1.442695, %v870_v38 }
 0x377   :  { %v1004_v41 = vpop.permute.xlu0 %1003  ;;  %v893_v42 = vsel %vm224_vm2, %v2265_v39, 0.0  ;;  %v1080_v53 = vpop.permute.xlu1 %1079 }
 0x378   :  { %2274 = vpow2.f32 %v885_v40  ;;  %894 = vadd.xlane.f32.xlu1 %v893_v42  ;;  %2130 = vmatpush3.msra.mxu1 %v1004_v41 }
 0x379   :  { %2139 = vmatprep.subr.mxu1 %v2403_v10 }
 0x37a   :  { %v2267_v43 = vpop.eup %2266 }
 0x37b   :  { %v2269_v44 = vpop.eup %2268  ;;  %v899_v45 = vsel %vm224_vm2, %v2267_v43, 0.0  ;;  %v1156_v54 = vpop.permute.xlu1 %1155 }
 0x37c   :  { %900 = vadd.xlane.f32.xlu1 %v899_v45  ;;  %v896_v46 = vsel %vm224_vm2, %v2269_v44, 0.0  ;;  %v1232_v55 = vpop.permute.xlu0 %1231 }
 0x37d   :  { %897 = vadd.xlane.f32.xlu0 %v896_v46 }
 0x37e   :  { %v2271_v47 = vpop.eup %2270 }
 0x37f   :  { %v2273_v48 = vpop.eup %2272  ;;  %v905_v49 = vsel %vm224_vm2, %v2271_v47, 0.0  ;;  %v1308_v56 = vpop.permute.xlu1 %1307 }
 0x380   :  { %906 = vadd.xlane.f32.xlu1 %v905_v49  ;;  %v902_v50 = vsel %vm224_vm2, %v2273_v48, 0.0 }
 0x381   :  { %903 = vadd.xlane.f32.xlu0 %v902_v50 }
 0x382   :  { %v2682_v51 = vpop.eup %2274 }
 0x383   :  { %v908_v52 = vsel %vm224_vm2, %v2682_v51, 0.0 }
 0x385   :  { %909 = vadd.xlane.f32.xlu0 %v908_v52 }
 0x391   :  { %1459 = vrot.lane.b32.xlu1 %v2590_v19, %s2409_s1 }
 0x39b   :  { %1383 = vrot.lane.b32.xlu0 %v2586_v18, %s2409_s1 }
 0x3ac   :  { %v892_v57 = vpop.xlane.xlu0 %891 }
 0x3ad   :  { %2276 = vrcp.f32 %v892_v57 }
 0x3b0   :  { %v889_v58 = vpop.xlane.xlu1 %888 }
 0x3b1   :  { %2278 = vrcp.f32 %v889_v58 }
 0x3b7   :  { %v2277_v59 = vpop.eup %2276 }
 0x3b8   :  { %v914_v60 = vmul.f32 %v2277_v59, %v2667_v15 }
 0x3ba   :  { %2132 = vmatmul.mubr.msk.f32.vlgmr.msra.gmra.mrb[12].mxu1 %vm224_vm2, %v914_v60 }
 0x3bb   :  { %v2279_v61 = vpop.eup %2278  ;;  %2140 = vmatpush3.msra.mxu1 %v1156_v54  ;;  %2141 = vmatprep.mubr.msk.f32.mxu1 %vm2406_vm1, %v2403_v10 }
 0x3bc   :  { %v912_v18 = vmul.f32 %v2279_v61, %v2671_v13  ;;  %2149 = vmatprep.subr.mxu1 %v2403_v10 }
 0x3be   :  { %2127 = vmatmul.mubr.msk.f32.vlgmr.msra.gmra.mrb[6].mxu0 %vm224_vm2, %v912_v18 }
 0x3bf   :  { %2135 = vmatpush3.msra.mxu0 %v1080_v53  ;;  %2136 = vmatprep.mubr.msk.f32.mxu0 %vm2406_vm1, %v2403_v10 }
 0x3c0   :  { %2144 = vmatprep.subr.mxu0 %v2403_v10 }
 0x405   :  { %v895_v19 = vpop.xlane.xlu1 %894 }
 0x406   :  { %2280 = vrcp.f32 %v895_v19 }
 0x409   :  { %v901_v62 = vpop.xlane.xlu1 %900 }
 0x40a   :  { %2282 = vrcp.f32 %v901_v62  ;;  %v898_v63 = vpop.xlane.xlu0 %897 }
 0x40b   :  { %2284 = vrcp.f32 %v898_v63 }
 0x40d   :  { %v907_v0 = vpop.xlane.xlu1 %906 }
 0x40e   :  { %2286 = vrcp.f32 %v907_v0  ;;  %v904_v1 = vpop.xlane.xlu0 %903 }
 0x40f   :  { %2288 = vrcp.f32 %v904_v1 }
 0x410   :  { %v2281_v2 = vpop.eup %2280 }
 0x411   :  { %v916_v3 = vmul.f32 %v2281_v2, %v2265_v39  ;;  %v1460_v13 = vpop.permute.xlu1 %1459 }
 0x412   :  { %v910_v4 = vpop.xlane.xlu0 %909 }
 0x413   :  { %2290 = vrcp.f32 %v910_v4  ;;  %2137 = vmatmul.mubr.msk.f32.vlgmr.msra.gmra.mrb[8].mxu0 %vm224_vm2, %v916_v3 }
 0x414   :  { %v2283_v6 = vpop.eup %2282  ;;  %2145 = vmatpush3.msra.mxu0 %v1232_v55  ;;  %2146 = vmatprep.mubr.msk.f32.mxu0 %vm2406_vm1, %v2403_v10  ;;  %v2000_v55 = vld [vmem:[%s2820_s5] ss:$0 sm:$0xff] }
 0x415   :  { %v2285_v8 = vpop.eup %2284  ;;  %v920_v9 = vmul.f32 %v2283_v6, %v2267_v43  ;;  %2154 = vmatprep.subr.mxu0 %v2403_v10 }
 0x416   :  { %v918_v11 = vmul.f32 %v2285_v8, %v2269_v44  ;;  %v1384_v20 = vpop.permute.xlu0 %1383 }
 0x417   :  { %2147 = vmatmul.mubr.msk.f32.vlgmr.msra.gmra.mrb[10].mxu0 %vm224_vm2, %v920_v9  ;;  %v1707_v9 = vld [vmem:[%s2823_s8 + $0x8] sm:$0xff] }
 0x418   :  { %v2287_v12 = vpop.eup %2286  ;;  %2142 = vmatmul.mubr.msk.f32.vlgmr.msra.gmra.mrb[14].mxu1 %vm224_vm2, %v918_v11  ;;  %2155 = vmatpush3.msra.mxu0 %v1384_v20  ;;  %v1708_v20 = vld [vmem:[%s2823_s8 + $0x10] sm:$0xff] }
 0x419   :  { %v2289_v21 = vpop.eup %2288  ;;  %v924_v15 = vmul.f32 %v2287_v12, %v2271_v47  ;;  %2150 = vmatpush3.msra.mxu1 %v1308_v56  ;;  %2151 = vmatprep.mubr.msk.f32.mxu1 %vm2406_vm1, %v2403_v10  ;;  %v1709_v12 = vld [vmem:[%s2823_s8 + $0x18] sm:$0xff] }
 0x41a   :  { %v922_v17 = vmul.f32 %v2289_v21, %v2273_v48  ;;  %2156 = vmatprep.mubr.msk.f32.mxu0 %vm2406_vm1, %v2403_v10  ;;  %2159 = vmatprep.subr.mxu1 %v2403_v10  ;;  %v2225_v21 = vpack.c.bf16 %v1709_v12, %v1708_v20 }
 0x41b   :  { %2157 = vmatmul.mubr.msk.f32.vlgmr.msra.gmra.mrb[12].mxu0 %vm224_vm2, %v924_v15  ;;  %2214 = vmatprep.subr.bf16.mxu0 %v2213_v28 }
 0x41c   :  { %2152 = vmatmul.mubr.msk.f32.vlgmr.msra.gmra.mrb[16].mxu1 %vm224_vm2, %v922_v17  ;;  %2216 = vmatpush3.bf16.msra.mxu0 %v2213_v28 }
 0x41d   :  { %v2291_v16 = vpop.eup %2290  ;;  %2160 = vmatpush3.msra.mxu1 %v1460_v13  ;;  %2161 = vmatprep.mubr.msk.f32.mxu1 %vm2406_vm1, %v2403_v10  ;;  %v1569_v10 = vld [vmem:[%s2819_s4 + $0x10] sm:$0xff] }
 0x41e   :  { %v926_v14 = vmul.f32 %v2291_v16, %v2682_v51  ;;  %v2217_v30 = vpack.c.bf16 %v1570_v29, %v1569_v10 }
 0x420   :  { %2162 = vmatmul.mubr.msk.f32.vlgmr.msra.gmra.mrb[18].mxu1 %vm224_vm2, %v926_v14  ;;  %2218 = vmatprep.subr.bf16.mxu0 %v2217_v30 }
 0x421   :  { %2220 = vmatpush3.bf16.msra.mxu0 %v2217_v30 }
 0x48d   :  { %v1075_v22 = vpop.f32.mrb[12].mxu1 }
 0x48e   :  { %v2133_v23 = vpop.f32.mrb[13].mxu1 }
 0x491   :  { %v999_v24 = vpop.f32.mrb[6].mxu0 }
 0x492   :  { %v2128_v25 = vpop.f32.mrb[7].mxu0 }
 0x4e6   :  { %v1151_v31 = vpop.f32.mrb[8].mxu0 }
 0x4e7   :  { %v2138_v32 = vpop.f32.mrb[9].mxu0  ;;  %1537 = vrot.lane.b32.xlu0 %v1151_v31, %s2401_s30 }
 0x4e8   :  { %v1808_v32 = vld [vmem:[%s2825_s10] sm:$0xff] }
 0x4ea   :  { %v1303_v33 = vpop.f32.mrb[10].mxu0 }
 0x4eb   :  { %v1227_v34 = vpop.f32.mrb[14].mxu1  ;;  %1545 = vrot.lane.b32.xlu0 %v1303_v33, %s2410_s9  ;;  %v2148_v35 = vpop.f32.mrb[11].mxu0  ;;  %v1809_v33 = vld [vmem:[%s2825_s10 + $0x8] sm:$0xff] }
 0x4ec   :  { %1539 = vrot.lane.b32.xlu1 %v1227_v34, %s2401_s30  ;;  %v2143_v36 = vpop.f32.mrb[15].mxu1  ;;  %v2229_v34 = vpack.c.bf16 %v1809_v33, %v1808_v32  ;;  %v1810_v35 = vld [vmem:[%s2825_s10 + $0x10] sm:$0xff] }
 0x4ed   :  { %v1811_v36 = vld [vmem:[%s2825_s10 + $0x18] sm:$0xff] }
 0x4ee   :  { %v1455_v37 = vpop.f32.mrb[12].mxu0  ;;  %2230 = vmatprep.subr.bf16.mxu0 %v2229_v34 }
 0x4ef   :  { %v1379_v38 = vpop.f32.mrb[16].mxu1  ;;  %1553 = vrot.lane.b32.xlu0 %v1455_v37, %s2411_s25  ;;  %v2158_v39 = vpop.f32.mrb[13].mxu0  ;;  %v2233_v37 = vpack.c.bf16 %v1811_v36, %v1810_v35 }
 0x4f0   :  { %1547 = vrot.lane.b32.xlu1 %v1379_v38, %s2410_s9  ;;  %v2153_v40 = vpop.f32.mrb[17].mxu1  ;;  %v1812_v38 = vld [vmem:[%s2825_s10 + $0x20] sm:$0xff]  ;;  %v1813_v39 = vld [vmem:[%s2825_s10 + $0x28] sm:$0xff] }
 0x4f1   :  { %v2237_v40 = vpack.c.bf16 %v1813_v39, %v1812_v38 }
 0x4f3   :  { %v1531_v41 = vpop.f32.mrb[18].mxu1 }
 0x4f4   :  { %1555 = vrot.lane.b32.xlu1 %v1531_v41, %s2411_s25  ;;  %v2163_v42 = vpop.f32.mrb[19].mxu1  ;;  %v1814_v41 = vld [vmem:[%s2825_s10 + $0x30] sm:$0xff] }
 0x4f5   :  { %v1815_v42 = vld [vmem:[%s2825_s10 + $0x38] sm:$0xff] }
 0x559   :  { %v1538_v43 = vpop.permute.xlu0 %1537 }
 0x55a   :  { %v1559_v46 = vsel %vm224_vm2, %v999_v24, %v1538_v43  ;;  %v2003_v24 = vld [vmem:[%s2821_s6] ss:$0 sm:$0xff]  ;;  %v2241_v43 = vpack.c.bf16 %v1815_v42, %v1814_v41 }
 0x55d   :  { %v1546_v44 = vpop.permute.xlu0 %1545 }
 0x55e   :  { %v1540_v45 = vpop.permute.xlu1 %1539  ;;  %v1562_v47 = vsel %vm1561_vm3, %v1559_v46, %v1546_v44  ;;  %v2005_v44 = vld [vmem:[#allocation7] ss:$0 sm:$0xff] }
 0x55f   :  { %v1560_v51 = vsel %vm224_vm2, %v1075_v22, %v1540_v45 }
 0x561   :  { %v1554_v48 = vpop.permute.xlu0 %1553 }
 0x562   :  { %v1565_v49 = vsel %vm1564_vm4, %v1562_v47, %v1554_v48  ;;  %v1548_v50 = vpop.permute.xlu1 %1547 }
 0x563   :  { %2172 = vmatprep.mubr.msk.f32.mxu0 %vm100_vm0, %v1565_v49  ;;  %v1563_v52 = vsel %vm1561_vm3, %v1560_v51, %v1548_v50 }
 0x566   :  { %v1556_v53 = vpop.permute.xlu1 %1555 }
 0x567   :  { %v1566_v54 = vsel %vm1564_vm4, %v1563_v52, %v1556_v53 }
 0x568   :  { %2173 = vmatmul.mubr.msk.f32.vlgmr.msra.gmra.mrb[14].mxu0 %vm100_vm0, %v1566_v54 }
 0x569   :  { %2232 = vmatpush3.bf16.msra.mxu0 %v2229_v34 }
 0x56a   :  { %2234 = vmatprep.subr.bf16.mxu0 %v2233_v37 }
 0x56d   :  { %2236 = vmatpush3.bf16.msra.mxu0 %v2233_v37 }
 0x56e   :  { %2238 = vmatprep.subr.bf16.mxu0 %v2237_v40 }
 0x571   :  { %2240 = vmatpush3.bf16.msra.mxu0 %v2237_v40 }
 0x572   :  { %2242 = vmatprep.subr.bf16.mxu0 %v2241_v43 }
 0x575   :  { %2244 = vmatpush3.bf16.msra.mxu0 %v2241_v43 }
 0x63b   :  { %v2174_v56 = vpop.f32.mrb[14].mxu0 }
 0x63c   :  { %v1656_v57 = vadd.f32 %v2174_v56, %v2000_v55  ;;  %v1650_v58 = vpop.f32.mrb[15].mxu0 }
 0x63d   :  { %v1651_v59 = vadd.f32 %v2000_v55, %v1650_v58 }
 0x63e   :  { %v1660_v60 = vadd.f32 %v1656_v57, %v2550_v7 }
 0x63f   :  { %v1659_v61 = vadd.f32 %v1651_v59, %v2546_v5  ;;  %v1706_v5 = vld [vmem:[%s2823_s8] sm:$0xff] }
 0x640   :  { %v1666_v18 = vsel %vm100_vm0, %v1660_v60, 0.0  ;;  %v2221_v11 = vpack.c.bf16 %v1707_v9, %v1706_v5  ;;  %v2008_v59 = vld [vmem:[%s2826_s11] ss:$0 sm:$0xff] }
 0x641   :  { %1667 = vadd.xlane.f32.xlu1 %v1666_v18  ;;  %v1663_v19 = vsel %vm100_vm0, %v1659_v61, 0.0 }
 0x642   :  { %1664 = vadd.xlane.f32.xlu0 %v1663_v19  ;;  %2222 = vmatprep.subr.bf16.mxu1 %v2221_v11 }
 0x643   :  { %2224 = vmatpush3.bf16.msra.mxu1 %v2221_v11 }
 0x644   :  { %2226 = vmatprep.subr.bf16.mxu1 %v2225_v21 }
 0x647   :  { %2228 = vmatpush3.bf16.msra.mxu1 %v2225_v21 }
 0x6ce   :  { %v1668_v62 = vpop.xlane.xlu1 %1667 }
 0x6cf   :  { %v1671_v63 = vmul.f32 0.03125, %v1668_v62  ;;  %v1665_v0 = vpop.xlane.xlu0 %1664 }
 0x6d0   :  { %v1670_v1 = vmul.f32 0.03125, %v1665_v0 }
 0x6d1   :  { %v1673_v2 = vsub.f32 %v1660_v60, %v1671_v63 }
 0x6d2   :  { %v1672_v3 = vsub.f32 %v1659_v61, %v1670_v1 }
 0x6d3   :  { %v1675_v8 = vmul.f32 %v1673_v2, %v1673_v2 }
 0x6d4   :  { %v1674_v4 = vmul.f32 %v1672_v3, %v1672_v3 }
 0x6d5   :  { %v1679_v7 = vsel %vm100_vm0, %v1675_v8, 0.0 }
 0x6d6   :  { %v1676_v6 = vsel %vm100_vm0, %v1674_v4, 0.0 }
 0x6d7   :  { %1677 = vadd.xlane.f32.xlu0 %v1676_v6 }
 0x6db   :  { %1680 = vadd.xlane.f32.xlu0 %v1679_v7 }
 0x764   :  { %v1678_v15 = vpop.xlane.xlu0 %1677 }
 0x765   :  { %v1682_v17 = vmul.f32 0.03125, %v1678_v15 }
 0x767   :  { %v1684_v13 = vadd.f32 1e-12, %v1682_v17 }
 0x768   :  { %v1681_v16 = vpop.xlane.xlu0 %1680 }
 0x769   :  { %2292 = vrsqrt.f32 %v1684_v13  ;;  %v1683_v14 = vmul.f32 0.03125, %v1681_v16 }
 0x76b   :  { %v1685_v22 = vadd.f32 1e-12, %v1683_v14 }
 0x76d   :  { %2294 = vrsqrt.f32 %v1685_v22  ;;  %v2011_v22 = vld [vmem:[%s2827_s12] ss:$0 sm:$0xff] }
 0x773   :  { %v2293_v23 = vpop.eup %2292 }
 0x774   :  { %v1688_v25 = vmul.f32 %v2293_v23, %v1672_v3 }
 0x776   :  { %v1696_v27 = vmul.f32 %v2003_v24, %v1688_v25 }
 0x777   :  { %v2295_v28 = vpop.eup %2294 }
 0x778   :  { %v1689_v10 = vmul.f32 %v2295_v28, %v1673_v2  ;;  %v1704_v29 = vadd.f32 %v2004_v26, %v1696_v27 }
 0x77a   :  { %v1697_v30 = vmul.f32 %v2003_v24, %v1689_v10  ;;  %2183 = vmatprep.mubr.msk.f32.mxu1 %vm100_vm0, %v1704_v29 }
 0x77c   :  { %v1705_v31 = vadd.f32 %v2004_v26, %v1697_v30  ;;  %v2012_v26 = vld [vmem:[%s2828_s13] ss:$0 sm:$0xff] }
 0x77e   :  { %2184 = vmatmul.mubr.msk.f32.vlgmr.msra.gmra.mrb[20].mxu1 %vm100_vm0, %v1705_v31 }
 0x851   :  { %v2185_v45 = vpop.f32.mrb[20].mxu1 }
 0x852   :  { %v1795_v46 = vadd.f32 %v2185_v45, %v2005_v44  ;;  %v1789_v47 = vpop.f32.mrb[21].mxu1 }
 0x853   :  { %v1790_v48 = vadd.f32 %v2005_v44, %v1789_v47 }
 0x854   :  { %v1801_v49 = vmul.f32 0.70710677, %v1795_v46  ;;  %v1799_v56 = vmul.f32 0.5, %v1795_v46 }
 0x855   :  { %v1800_v50 = vmul.f32 0.70710677, %v1790_v48  ;;  %v1798_v54 = vmul.f32 0.5, %v1790_v48 }
 0x856   :  { %2296 = verf.f32 %v1801_v49 }
 0x857   :  { %2298 = verf.f32 %v1800_v50 }
 0x860   :  { %v2297_v51 = vpop.eup %2296 }
 0x861   :  { %v2299_v52 = vpop.eup %2298  ;;  %v1805_v53 = vadd.f32 1.0, %v2297_v51 }
 0x862   :  { %v1804_v55 = vadd.f32 1.0, %v2299_v52 }
 0x863   :  { %v1807_v58 = vmul.f32 %v1805_v53, %v1799_v56 }
 0x864   :  { %v1806_v57 = vmul.f32 %v1804_v55, %v1798_v54 }
 0x866   :  { %2202 = vmatprep.mubr.msk.f32.mxu0 %vm1823_vm5, %v1806_v57 }
 0x867   :  { %2203 = vmatmul.mubr.msk.f32.vlgmr.msra.gmra.mrb[16].mxu0 %vm1823_vm5, %v1807_v58 }
 0x93a   :  { %v2204_v60 = vpop.f32.mrb[16].mxu0 }
 0x93b   :  { %v1902_v61 = vadd.f32 %v2204_v60, %v2008_v59  ;;  %v1896_v18 = vpop.f32.mrb[17].mxu0 }
 0x93c   :  { %v1897_v19 = vadd.f32 %v2008_v59, %v1896_v18 }
 0x93d   :  { %v1906_v62 = vadd.f32 %v1902_v61, %v1705_v31 }
 0x93e   :  { %v1905_v63 = vadd.f32 %v1897_v19, %v1704_v29 }
 0x93f   :  { %v1912_v0 = vsel %vm100_vm0, %v1906_v62, 0.0 }
 0x940   :  { %1913 = vadd.xlane.f32.xlu0 %v1912_v0  ;;  %v1909_v1 = vsel %vm100_vm0, %v1905_v63, 0.0 }
 0x941   :  { %1910 = vadd.xlane.f32.xlu1 %v1909_v1 }
 0x9cd   :  { %v1914_v2 = vpop.xlane.xlu0 %1913 }
 0x9ce   :  { %v1916_v3 = vmul.f32 0.03125, %v1914_v2  ;;  %v1911_v4 = vpop.xlane.xlu1 %1910 }
 0x9cf   :  { %v1915_v6 = vmul.f32 0.03125, %v1911_v4 }
 0x9d0   :  { %v1918_v8 = vsub.f32 %v1906_v62, %v1916_v3 }
 0x9d1   :  { %v1917_v7 = vsub.f32 %v1905_v63, %v1915_v6 }
 0x9d2   :  { %v1920_v5 = vmul.f32 %v1918_v8, %v1918_v8 }
 0x9d3   :  { %v1919_v9 = vmul.f32 %v1917_v7, %v1917_v7 }
 0x9d4   :  { %v1924_v11 = vsel %vm100_vm0, %v1920_v5, 0.0 }
 0x9d5   :  { %1925 = vadd.xlane.f32.xlu0 %v1924_v11  ;;  %v1921_v20 = vsel %vm100_vm0, %v1919_v9, 0.0 }
 0x9d6   :  { %1922 = vadd.xlane.f32.xlu1 %v1921_v20 }
 0xa62   :  { %v1926_v12 = vpop.xlane.xlu0 %1925 }
 0xa63   :  { %v1928_v21 = vmul.f32 0.03125, %v1926_v12  ;;  %v1923_v15 = vpop.xlane.xlu1 %1922 }
 0xa64   :  { %v1927_v17 = vmul.f32 0.03125, %v1923_v15 }
 0xa65   :  { %v1930_v13 = vadd.f32 1e-12, %v1928_v21 }
 0xa66   :  { %v1929_v16 = vadd.f32 1e-12, %v1927_v17 }
 0xa67   :  { %2300 = vrsqrt.f32 %v1930_v13 }
 0xa68   :  { %2302 = vrsqrt.f32 %v1929_v16 }
 0xa71   :  { %v2301_v14 = vpop.eup %2300 }
 0xa72   :  { %v2303_v23 = vpop.eup %2302  ;;  %v1934_v24 = vmul.f32 %v2301_v14, %v1918_v8 }
 0xa73   :  { %v1933_v25 = vmul.f32 %v2303_v23, %v1917_v7 }
 0xa74   :  { %v1942_v27 = vmul.f32 %v2011_v22, %v1934_v24 }
 0xa75   :  { %v1941_v28 = vmul.f32 %v2011_v22, %v1933_v25 }
 0xa76   :  { %v1950_v10 = vadd.f32 %v2012_v26, %v1942_v27 }
 0xa77   :  { %v1949_v29 = vadd.f32 %v2012_v26, %v1941_v28 }
 0xa78   :  { %1952 = vst.msk [vmem:[#allocation8 + $0x8] sm:$0xff] %vm100_vm0, %v1950_v10 }
 0xa79   :  { %1951 = vst.msk [vmem:[#allocation8] sm:$0xff] %vm100_vm0, %v1949_v29 }
 0xa7a   :  { %2381 = shalt.err (!%p2378_p0)
}
 0xa7b   :  { %s2382_s1 = scalar_lea.hbm %s2829_s14, 256 }
 0xa7c   :  { %p2383_p1 = scmp.ne.s32.totalorder %s2829_s14, %s2382_s1  ;;  %p2386_p2 = scmp.lt.u32.totalorder %s2382_s1, %s2829_s14 }
 0xa7e   :  { %p2388_p3 = pnand %p2386_p2, %p2383_p1 }
 0xa80   :  { %2391 = shalt.err (!%p2388_p3)
}
 0xa81   :  { %1964 = dma.vmem_to_hbm [thread:$0]  %s1959_s0, 256, %s2829_s14, [#allocation4], %s2400_s7, %s2400_s7, %s2401_s30  }
 0xa82   :  { %2396 = dma.done.wait [#allocation4], 256  }
 0xa83   :  { %2397 = vsyncadd [#allocation4], 4294967040 }
 0xa84   :  { %1968 = vsyncpa [#allocation3], 1 }
 0xa85   :  { %1969 = vsyncpa [#allocation6], 1 }
 0xa86   :  { %1970 = vsyncpa [#allocation4], 1 }

</bundles_post_ra>
